<compile_context>
chip_gen: v6e
topology: v6e:2x2x1
jax: 0.10.0
libtpu: 0.0.40
codegen_flags: <defaults>
</compile_context>

<pallas_src>
import functools

import jax
import jax.numpy as jnp
from jax.experimental import pallas as pl
from jax.experimental.pallas import tpu as pltpu

HEADS = 2
DIM_HEAD = 64


def _choose_bblk(batch, seq, target_rows=256):
    """How many batch elements to fold into one grid step.

    Pick the largest divisor of B such that m = bblk*seq does not exceed
    `target_rows` (~one MXU M tile on v6e/v7x, two passes on v5e). No forced
    minimum grid length: on single-TC chips extra grid steps are a pure serial
    loop (~0.35 us / ~600 cycles each) and halve MXU M-fill. On v7x a 2-way
    split only pays once each TC gets >= ~128-256 rows, which this heuristic
    produces naturally for large B*N.
    """
    cap = max(1, target_rows // max(seq, 1))
    bblk = 1
    for cand in range(1, min(cap, batch) + 1):
        if batch % cand == 0:
            bblk = cand
    return bblk


def attention_kernel(x_ref, wqkv_ref, wout_ref, bout_ref, o_ref, *,
                     bblk, seq, dim, heads, dim_head):
    """Fused attention for a block of `bblk` batch elements (rows flattened).

    x_ref   : (bblk*seq, dim)    activations (compute dtype, e.g. bf16)
    wqkv_ref: (dim, 3*inner)     fused QKV weight; Q columns pre-scaled
    wout_ref: (inner, dim)       output projection weight
    bout_ref: (1, dim)           output projection bias (f32)
    o_ref   : (bblk*seq, dim)    output tile
    """
    inner = heads * dim_head
    m = bblk * seq
    cdt = x_ref.dtype            # bf16 MXU operand dtype (f32 accumulation)

    # One big fused QKV projection over all bblk*seq rows (batch/seq already
    # flattened by the wrapper, so no in-kernel relayout is needed here).
    qkv = jnp.dot(x_ref[...], wqkv_ref[...],
                  preferred_element_type=jnp.float32)           # (m, 3*inner) f32
    # Single cast pass to the MXU operand dtype; softmax math stays f32.
    qkv_c = qkv.astype(cdt)

    # Accumulator starts from the bias broadcast: saves a zero-fill and a
    # trailing (m, dim) f32 add per grid step.
    y = jnp.broadcast_to(bout_ref[...], (m, dim)).astype(jnp.float32)

    # TODO(synk): dh=64 per-head slices start at non-128-aligned lane offsets
    # (64/192/320); if the bundle dump shows XLU lane rotates dominating,
    # restructure to lane-aligned (m,128) slabs with the head split as a
    # dot_general batch dim (measure first - the alternative also relayouts).
    for h in range(heads):                                      # small & static
        lo = h * dim_head
        # Per-head views; softmax scale is already baked into the Q columns.
        # The (m, dh) -> (bblk, seq, dh) split is a pure sublane-group split.
        q3 = qkv_c[:, lo:lo + dim_head].reshape(bblk, seq, dim_head)
        k3 = qkv_c[:, inner + lo:inner + lo + dim_head].reshape(
            bblk, seq, dim_head)
        v3 = qkv_c[:, 2 * inner + lo:2 * inner + lo + dim_head].reshape(
            bblk, seq, dim_head)

        # Scores: contract K's feature dim directly (no kh.T relayout). The
        # bblk axis is a dot_general batch dim, so attention never mixes rows
        # across different batch elements.
        dots = jnp.einsum('bnd,bmd->bnm', q3, k3,
                          preferred_element_type=jnp.float32)   # (bblk, seq, seq)

        # Softmax in f32 (v5e has no bf16 VPU/EUP); approx reciprocal -> EUP.
        dots = dots - jnp.max(dots, axis=-1, keepdims=True)
        e = jnp.exp(dots)
        attn = e * pl.reciprocal(jnp.sum(e, axis=-1, keepdims=True),
                                 approx=True)

        out_h = jnp.einsum('bnm,bmd->bnd', attn.astype(cdt), v3,
                           preferred_element_type=jnp.float32)  # (bblk, seq, dh)

        # Accumulate the output projection per head: the W_out row slice is
        # sublane-aligned (dim_head % 8 == 0), so no lane concat is needed.
        w_h = wout_ref[lo:lo + dim_head, :]                     # (dh, dim)
        y = y + jnp.dot(out_h.reshape(m, dim_head).astype(cdt), w_h,
                        preferred_element_type=jnp.float32)

    # Lane-sparse store (D=32) kept as-is: per-step output is only ~KiB-scale,
    # and a lane-dense (seq*dim) flatten would be an XLU-heavy relayout.
    # TODO(synk): for large seq, replace the dense (seq, seq) scores with
    # flash-style online-softmax KV tiling; size KV tiles + double buffers
    # against v7x's 64 MiB physical / 32 MiB default scoped VMEM (not the
    # 128 MiB of v5e/v6e) and set vmem_limit_bytes explicitly.
    o_ref[...] = y.astype(o_ref.dtype)


def attention(x, w_qkv, w_out, b_out, *, heads=HEADS, dim_head=DIM_HEAD,
              compute_dtype=jnp.bfloat16, bblk=None):
    """x: (B, N, D); w_qkv: (3*inner, D); w_out: (D, inner); b_out: (D,).

    Weights use torch.nn.Linear's (out_features, in_features) convention.
    Dropout (p=0.0, eval) is an identity and therefore omitted.
    """
    B, N, D = x.shape
    inner = heads * dim_head
    scale = dim_head ** (-0.5)

    if bblk is None:
        bblk = _choose_bblk(B, N)
    assert B % bblk == 0
    grid = (B // bblk,)
    m_blk = bblk * N

    # Fold the softmax scale into the Q columns of the fused QKV weight and
    # pre-transpose to (in, out) so the kernel issues plain row-major matmuls.
    wqkv_t = jnp.transpose(w_qkv).astype(jnp.float32)           # (D, 3*inner)
    wqkv_t = wqkv_t.at[:, :inner].multiply(scale)
    wout_t = jnp.transpose(w_out)                               # (inner, D)
    bout2 = b_out.reshape(1, D).astype(jnp.float32)

    # bf16 MXU operands; accumulation stays f32 inside the kernel. Also halves
    # the activation/weight bytes DMA'd per grid step. Batch/seq are flattened
    # here (free contiguous reshape in XLA) so the kernel sees 2-D row blocks.
    x_c = x.reshape(B * N, D).astype(compute_dtype)
    wqkv_c = wqkv_t.astype(compute_dtype)
    wout_c = wout_t.astype(compute_dtype)

    kernel = functools.partial(attention_kernel, bblk=bblk, seq=N, dim=D,
                               heads=heads, dim_head=dim_head)

    # Advisory cost hint so XLA can schedule neighboring ops around this call.
    cdt_bytes = jnp.dtype(compute_dtype).itemsize
    out_bytes = jnp.dtype(x.dtype).itemsize
    flops = (2 * B * N * D * 3 * inner                 # fused QKV projection
             + 2 * B * heads * N * N * dim_head        # Q @ K^T
             + 2 * B * heads * N * N * dim_head        # attn @ V
             + 2 * B * N * inner * D)                  # output projection
    cost = pl.CostEstimate(
        flops=flops,
        transcendentals=B * heads * N * N,             # exp in softmax
        bytes_accessed=(B * N * D * cdt_bytes          # x
                        + D * 3 * inner * cdt_bytes    # w_qkv
                        + inner * D * cdt_bytes        # w_out
                        + D * 4                        # bias (f32)
                        + B * N * D * out_bytes))      # output

    out_flat = pl.pallas_call(
        kernel,
        out_shape=jax.ShapeDtypeStruct((B * N, D), x.dtype),
        grid_spec=pltpu.PrefetchScalarGridSpec(
            num_scalar_prefetch=0,
            grid=grid,
            in_specs=[
                pl.BlockSpec((m_blk, D), lambda b: (b, 0)),
                # Constant-index weight/bias blocks; small enough today that
                # default double buffering is harmless (tens of KiB).
                pl.BlockSpec((D, 3 * inner), lambda b: (0, 0)),
                pl.BlockSpec((inner, D), lambda b: (0, 0)),
                pl.BlockSpec((1, D), lambda b: (0, 0)),
            ],
            out_specs=pl.BlockSpec((m_blk, D), lambda b: (b, 0)),
        ),
        compiler_params=pltpu.CompilerParams(
            # Tiny tiles fit the default scoped VMEM; raise vmem_limit_bytes
            # here when scaling N or bblk (defaults: 16 MiB v5e, 32 MiB v6e,
            # 32 MiB scoped / 64 MiB physical on v7x).
            dimension_semantics=("parallel",)),
        cost_estimate=cost,
    )(x_c, wqkv_c, wout_c, bout2)

    return out_flat.reshape(B, N, D)


def attention_ref(x, w_qkv, w_out, b_out, *, heads=HEADS, dim_head=DIM_HEAD):
    """Pure-JAX f32 reference mirroring the PyTorch forward (eval, dropout=0)."""
    B, N, D = x.shape
    inner = heads * dim_head
    scale = dim_head ** (-0.5)
    qkv = jnp.einsum('bnd,od->bno', x, w_qkv)                   # (B, N, 3*inner)
    q, k, v = jnp.split(qkv, 3, axis=-1)

    def to_heads(t):
        return t.reshape(B, N, heads, dim_head).transpose(0, 2, 1, 3)

    q, k, v = map(to_heads, (q, k, v))                          # (B, H, N, d)
    dots = jnp.einsum('bhnd,bhmd->bhnm', q, k) * scale
    attn = jax.nn.softmax(dots, axis=-1)
    out = jnp.einsum('bhnm,bhmd->bhnd', attn, v)
    out = out.transpose(0, 2, 1, 3).reshape(B, N, inner)
    return jnp.einsum('bni,oi->bno', out, w_out) + b_out


if __name__ == "__main__":
    inner = HEADS * DIM_HEAD

    # Two tiny configs: with the new heuristic both collapse to a single grid
    # step (bblk = B), maximizing MXU M-fill on single-TC chips.
    for (B, N, D) in [(2, 8, 32), (8, 8, 32)]:
        key = jax.random.PRNGKey(0)
        kx, kq, kw, kb = jax.random.split(key, 4)

        x = jax.random.normal(kx, (B, N, D), dtype=jnp.float32)

        # Deterministic nn.Linear-style init: U(-1/sqrt(fan_in), 1/sqrt(fan_in)).
        bound_qkv = 1.0 / (D ** 0.5)
        w_qkv = jax.random.uniform(kq, (3 * inner, D), jnp.float32,
                                   -bound_qkv, bound_qkv)
        bound_out = 1.0 / (inner ** 0.5)
        w_out = jax.random.uniform(kw, (D, inner), jnp.float32,
                                   -bound_out, bound_out)
        b_out = jax.random.uniform(kb, (D,), jnp.float32, -bound_out, bound_out)

        y = jax.block_until_ready(attention(x, w_qkv, w_out, b_out))
        y_ref = attention_ref(x, w_qkv, w_out, b_out)

        assert y.shape == (B, N, D)
        # Tolerance loosened for bf16 MXU operands + approx reciprocal.
        err = float(jnp.max(jnp.abs(y - y_ref)))
        assert jnp.allclose(y, y_ref, atol=3e-2, rtol=3e-2), (
            f"mismatch vs reference at B={B}: max abs err {err}")

    print("KERNEL_OK")
</pallas_src>

<mosaic_0001>
module attributes {stable_mosaic.version = 11 : i64} {
  func.func @attention_kernel(%arg0: i32, %arg1: memref<16x32xbf16, #tpu.memory_space<vmem>>, %arg2: memref<32x384xbf16, #tpu.memory_space<vmem>>, %arg3: memref<128x32xbf16, #tpu.memory_space<vmem>>, %arg4: memref<1x32xf32, #tpu.memory_space<vmem>>, %arg5: memref<16x32xf32, #tpu.memory_space<vmem>>) attributes {dimension_semantics = [#tpu.dimension_semantics<parallel>], iteration_bounds = array<i64: 1>, scalar_prefetch = 0 : i64, scratch_operands = 0 : i64, tpu.core_type = #tpu.core_type<tc>, window_params = [{transform_indices = @transform_0, window_bounds = array<i64: 16, 32>}, {pipeline_mode = #tpu.pipeline_mode<synchronous>, transform_indices = @transform_1, window_bounds = array<i64: 32, 384>}, {pipeline_mode = #tpu.pipeline_mode<synchronous>, transform_indices = @transform_2, window_bounds = array<i64: 128, 32>}, {pipeline_mode = #tpu.pipeline_mode<synchronous>, transform_indices = @transform_3, window_bounds = array<i64: 1, 32>}, {transform_indices = @transform_4, window_bounds = array<i64: 16, 32>}]} {
    %c0 = arith.constant 0 : index
    %c0_0 = arith.constant 0 : index
    %0 = vector.load %arg1[%c0, %c0_0] : memref<16x32xbf16, #tpu.memory_space<vmem>>, vector<16x32xbf16>
    %c0_1 = arith.constant 0 : index
    %c0_2 = arith.constant 0 : index
    %1 = vector.load %arg2[%c0_1, %c0_2] : memref<32x384xbf16, #tpu.memory_space<vmem>>, vector<32x384xbf16>
    %cst = arith.constant dense<0.000000e+00> : vector<16x384xf32>
    %2 = tpu.matmul %0, %1, %cst {dimension_numbers = #tpu.dot_dimension_numbers<[1], [0], [0], [1], [0, 0, 1, 1], [], []>} : vector<16x32xbf16>, vector<32x384xbf16>, vector<16x384xf32> -> vector<16x384xf32>
    %3 = arith.truncf %2 : vector<16x384xf32> to vector<16x384xbf16>
    %c0_3 = arith.constant 0 : index
    %c0_4 = arith.constant 0 : index
    %4 = vector.load %arg4[%c0_3, %c0_4] : memref<1x32xf32, #tpu.memory_space<vmem>>, vector<1x32xf32>
    %5 = vector.shape_cast %4 : vector<1x32xf32> to vector<1x32xf32>
    %6 = vector.broadcast %5 : vector<1x32xf32> to vector<16x32xf32>
    %7 = vector.extract_strided_slice %3 {offsets = [0, 0], sizes = [16, 64], strides = [1, 1]} : vector<16x384xbf16> to vector<16x64xbf16>
    %8 = vector.shape_cast %7 : vector<16x64xbf16> to vector<2x8x64xbf16>
    %9 = vector.extract_strided_slice %3 {offsets = [0, 128], sizes = [16, 64], strides = [1, 1]} : vector<16x384xbf16> to vector<16x64xbf16>
    %10 = vector.shape_cast %9 : vector<16x64xbf16> to vector<2x8x64xbf16>
    %11 = vector.extract_strided_slice %3 {offsets = [0, 256], sizes = [16, 64], strides = [1, 1]} : vector<16x384xbf16> to vector<16x64xbf16>
    %12 = vector.shape_cast %11 : vector<16x64xbf16> to vector<2x8x64xbf16>
    "tpu.trace_start"() <{level = 10 : i32, message = "bnd,bmd->bnm"}> : () -> ()
    %cst_5 = arith.constant dense<0.000000e+00> : vector<2x8x8xf32>
    %13 = tpu.matmul %8, %10, %cst_5 {dimension_numbers = #tpu.dot_dimension_numbers<[2], [2], [1], [1], [0, 0, 0, 1, 1, 1], [0], [0]>} : vector<2x8x64xbf16>, vector<2x8x64xbf16>, vector<2x8x8xf32> -> vector<2x8x8xf32>
    "tpu.trace_stop"() : () -> ()
    %cst_6 = arith.constant dense<0xFF800000> : vector<2x8xf32>
    %14 = vector.multi_reduction <maximumf>, %13, %cst_6 [2] : vector<2x8x8xf32> to vector<2x8xf32>
    %15 = vector.shape_cast %14 : vector<2x8xf32> to vector<2x8x1xf32>
    %16 = vector.broadcast %15 : vector<2x8x1xf32> to vector<2x8x8xf32>
    %17 = arith.subf %13, %16 : vector<2x8x8xf32>
    %18 = math.exp %17 : vector<2x8x8xf32>
    %cst_7 = arith.constant dense<0.000000e+00> : vector<2x8xf32>
    %19 = vector.multi_reduction <add>, %18, %cst_7 [2] : vector<2x8x8xf32> to vector<2x8xf32>
    %20 = vector.shape_cast %19 : vector<2x8xf32> to vector<2x8x1xf32>
    %21 = tpu.reciprocal %20 {approx = true} : vector<2x8x1xf32> -> vector<2x8x1xf32>
    %22 = vector.broadcast %21 : vector<2x8x1xf32> to vector<2x8x8xf32>
    %23 = arith.mulf %18, %22 : vector<2x8x8xf32>
    %24 = arith.truncf %23 : vector<2x8x8xf32> to vector<2x8x8xbf16>
    "tpu.trace_start"() <{level = 10 : i32, message = "bnm,bmd->bnd"}> : () -> ()
    %cst_8 = arith.constant dense<0.000000e+00> : vector<2x8x64xf32>
    %25 = tpu.matmul %24, %12, %cst_8 {dimension_numbers = #tpu.dot_dimension_numbers<[2], [1], [1], [2], [0, 0, 0, 1, 1, 2], [0], [0]>} : vector<2x8x8xbf16>, vector<2x8x64xbf16>, vector<2x8x64xf32> -> vector<2x8x64xf32>
    "tpu.trace_stop"() : () -> ()
    %c0_9 = arith.constant 0 : index
    %c0_10 = arith.constant 0 : index
    %26 = vector.load %arg3[%c0_9, %c0_10] : memref<128x32xbf16, #tpu.memory_space<vmem>>, vector<64x32xbf16>
    %27 = vector.shape_cast %25 : vector<2x8x64xf32> to vector<16x64xf32>
    %28 = arith.truncf %27 : vector<16x64xf32> to vector<16x64xbf16>
    %cst_11 = arith.constant dense<0.000000e+00> : vector<16x32xf32>
    %29 = tpu.matmul %28, %26, %cst_11 {dimension_numbers = #tpu.dot_dimension_numbers<[1], [0], [0], [1], [0, 0, 1, 1], [], []>} : vector<16x64xbf16>, vector<64x32xbf16>, vector<16x32xf32> -> vector<16x32xf32>
    %30 = arith.addf %6, %29 : vector<16x32xf32>
    %31 = vector.extract_strided_slice %3 {offsets = [0, 64], sizes = [16, 64], strides = [1, 1]} : vector<16x384xbf16> to vector<16x64xbf16>
    %32 = vector.shape_cast %31 : vector<16x64xbf16> to vector<2x8x64xbf16>
    %33 = vector.extract_strided_slice %3 {offsets = [0, 192], sizes = [16, 64], strides = [1, 1]} : vector<16x384xbf16> to vector<16x64xbf16>
    %34 = vector.shape_cast %33 : vector<16x64xbf16> to vector<2x8x64xbf16>
    %35 = vector.extract_strided_slice %3 {offsets = [0, 320], sizes = [16, 64], strides = [1, 1]} : vector<16x384xbf16> to vector<16x64xbf16>
    %36 = vector.shape_cast %35 : vector<16x64xbf16> to vector<2x8x64xbf16>
    "tpu.trace_start"() <{level = 10 : i32, message = "bnd,bmd->bnm"}> : () -> ()
    %cst_12 = arith.constant dense<0.000000e+00> : vector<2x8x8xf32>
    %37 = tpu.matmul %32, %34, %cst_12 {dimension_numbers = #tpu.dot_dimension_numbers<[2], [2], [1], [1], [0, 0, 0, 1, 1, 1], [0], [0]>} : vector<2x8x64xbf16>, vector<2x8x64xbf16>, vector<2x8x8xf32> -> vector<2x8x8xf32>
    "tpu.trace_stop"() : () -> ()
    %cst_13 = arith.constant dense<0xFF800000> : vector<2x8xf32>
    %38 = vector.multi_reduction <maximumf>, %37, %cst_13 [2] : vector<2x8x8xf32> to vector<2x8xf32>
    %39 = vector.shape_cast %38 : vector<2x8xf32> to vector<2x8x1xf32>
    %40 = vector.broadcast %39 : vector<2x8x1xf32> to vector<2x8x8xf32>
    %41 = arith.subf %37, %40 : vector<2x8x8xf32>
    %42 = math.exp %41 : vector<2x8x8xf32>
    %cst_14 = arith.constant dense<0.000000e+00> : vector<2x8xf32>
    %43 = vector.multi_reduction <add>, %42, %cst_14 [2] : vector<2x8x8xf32> to vector<2x8xf32>
    %44 = vector.shape_cast %43 : vector<2x8xf32> to vector<2x8x1xf32>
    %45 = tpu.reciprocal %44 {approx = true} : vector<2x8x1xf32> -> vector<2x8x1xf32>
    %46 = vector.broadcast %45 : vector<2x8x1xf32> to vector<2x8x8xf32>
    %47 = arith.mulf %42, %46 : vector<2x8x8xf32>
    %48 = arith.truncf %47 : vector<2x8x8xf32> to vector<2x8x8xbf16>
    "tpu.trace_start"() <{level = 10 : i32, message = "bnm,bmd->bnd"}> : () -> ()
    %cst_15 = arith.constant dense<0.000000e+00> : vector<2x8x64xf32>
    %49 = tpu.matmul %48, %36, %cst_15 {dimension_numbers = #tpu.dot_dimension_numbers<[2], [1], [1], [2], [0, 0, 0, 1, 1, 2], [0], [0]>} : vector<2x8x8xbf16>, vector<2x8x64xbf16>, vector<2x8x64xf32> -> vector<2x8x64xf32>
    "tpu.trace_stop"() : () -> ()
    %c64 = arith.constant 64 : index
    %c0_16 = arith.constant 0 : index
    %50 = vector.load %arg3[%c64, %c0_16] : memref<128x32xbf16, #tpu.memory_space<vmem>>, vector<64x32xbf16>
    %51 = vector.shape_cast %49 : vector<2x8x64xf32> to vector<16x64xf32>
    %52 = arith.truncf %51 : vector<16x64xf32> to vector<16x64xbf16>
    %cst_17 = arith.constant dense<0.000000e+00> : vector<16x32xf32>
    %53 = tpu.matmul %52, %50, %cst_17 {dimension_numbers = #tpu.dot_dimension_numbers<[1], [0], [0], [1], [0, 0, 1, 1], [], []>} : vector<16x64xbf16>, vector<64x32xbf16>, vector<16x32xf32> -> vector<16x32xf32>
    %54 = arith.addf %30, %53 : vector<16x32xf32>
    %c0_18 = arith.constant 0 : index
    %c0_19 = arith.constant 0 : index
    %55 = vector.load %arg5[%c0_18, %c0_19] : memref<16x32xf32, #tpu.memory_space<vmem>>, vector<16x32xf32>
    tpu.vector_store %arg5[%c0_18, %c0_19], %54 {strides = array<i32>} : memref<16x32xf32, #tpu.memory_space<vmem>>, vector<16x32xf32>,
    return
  }
  func.func @transform_0(%arg0: i32) -> (i32, i32) {
    %c0_i32 = arith.constant 0 : i32
    %c0_i32_0 = arith.constant 0 : i32
    return %arg0, %c0_i32 : i32, i32
  }
  func.func @transform_1(%arg0: i32) -> (i32, i32) {
    %c0_i32 = arith.constant 0 : i32
    %c0_i32_0 = arith.constant 0 : i32
    %c0_i32_1 = arith.constant 0 : i32
    return %c0_i32, %c0_i32_0 : i32, i32
  }
  func.func @transform_2(%arg0: i32) -> (i32, i32) {
    %c0_i32 = arith.constant 0 : i32
    %c0_i32_0 = arith.constant 0 : i32
    %c0_i32_1 = arith.constant 0 : i32
    return %c0_i32, %c0_i32_0 : i32, i32
  }
  func.func @transform_3(%arg0: i32) -> (i32, i32) {
    %c0_i32 = arith.constant 0 : i32
    %c0_i32_0 = arith.constant 0 : i32
    %c0_i32_1 = arith.constant 0 : i32
    return %c0_i32, %c0_i32_0 : i32, i32
  }
  func.func @transform_4(%arg0: i32) -> (i32, i32) {
    %c0_i32 = arith.constant 0 : i32
    %c0_i32_0 = arith.constant 0 : i32
    return %arg0, %c0_i32 : i32, i32
  }
}

</mosaic_0001>

<bundles_post_ra>
// kernel: tpu_custom_call.1
= control target key start
LH: loop header
LB: loop body
LE: loop exit
PB: predicated region body
PF: predicated region fallthrough
CT: control target
= control target key end

     0   :  { %v997_v2 = vmov 0   ;;  %v998_v4 = vmov 0.0   ;;  %vm66_vm0 = vcmask 261120   ;;  %s1160_s0 = inlined_call_operand.vmem [shape: bf16[16,32], index: 0, kind: input, shape index: {}]   ;;  %s1161_s1 = inlined_call_operand.vmem [shape: bf16[32,384], index: 1, kind: input, shape index: {}]   ;;  %s1162_s2 = inlined_call_operand.vmem [shape: bf16[128,32], index: 2, kind: input, shape index: {}]   ;;  %s1163_s3 = inlined_call_operand.vmem [shape: f32[1,32], index: 3, kind: input, shape index: {}]   ;;  %s1164_s4 = inlined_call_operand.hbm [shape: f32[16,32], index: 4, kind: output, shape index: {}]  }
   0x1   :  { %v942_v0 = vld [vmem:[%s1161_s1 + $0x1c] ss:$12 sps:$4 sm:$0xff]   ;;  %v944_v1 = vld [vmem:[%s1161_s1 + $0x18] ss:$12 sps:$4 sm:$0xff]   ;;  %102 = vmatprep.mubr.bf16.mxu1 %v997_v2  ;;  %863 = vmatprep.subr.bf16.mxu0 %v998_v4  ;;  %v947_v5 = vld [vmem:[%s1161_s1] ss:$12 sps:$4 sm:$0xff]  }
   0x2   :  { %82 = vmatprep.subr.bf16.mxu1 %v942_v0  ;;  %v945_v3 = vld [vmem:[%s1161_s1 + $0x4] ss:$12 sps:$4 sm:$0xff]   ;;  %v949_v7 = vld [vmem:[%s1161_s1 + $0x20] ss:$12 sps:$4 sm:$0xff]  }
   0x3   :  { %83 = vmatpush1.bf16.msra.mxu1 %v944_v1  ;;  %v948_v6 = vld [vmem:[%s1160_s0] sm:$0xff]  }
   0x4   :  { %84 = vmatprep.subr.bf16.mxu1 %v945_v3 }
   0x7   :  { %85 = vmatpush1.bf16.msra.mxu1 %v947_v5 }
   0x8   :  { %855 = vmatprep.subr.bf16.mxu1 %v998_v4 }
   0xa   :  { %793 = vmatmul.mubr.msk.bf16.vlgmr.msra.gmra.mxu1 %vm66_vm0, %v948_v6 }
   0xb   :  { %9 = vsyncpa [#allocation3], 0  ;;  %856 = vmatpush3.bf16.msra.mxu1 %v949_v7  ;;  %v950_v8 = vld [vmem:[%s1161_s1 + $0x8] ss:$12 sps:$4 sm:$0xff]   ;;  %vm999_vm1 = vmmov 0   ;;  %vm179_vm2 = vcmask 523264  }
   0xc   :  { %857 = vmatprep.subr.bf16.mxu1 %v998_v4  ;;  %859 = vmatprep.mubr.msk.bf16.mxu1 %vm999_vm1, %v998_v4  ;;  %s1000_s0 = smov 64   ;;  %vm300_vm3 = vcmask 1043456   ;;  %vm272_vm4 = vcmask 64512   ;;  %v951_v61 = vld [vmem:[%s1162_s2 + $0x18] sm:$0xff]   ;;  %v952_v62 = vld [vmem:[%s1162_s2 + $0x10] sm:$0xff]   ;;  %v953_v63 = vld [vmem:[%s1162_s2 + $0x8] sm:$0xff]  }
   0xd   :  { %865 = vmatprep.mubr.msk.bf16.mxu0 %vm999_vm1, %v998_v4  ;;  %v954_v0 = vld [vmem:[%s1162_s2] sm:$0xff]  }
   0xf   :  { %858 = vmatpush3.bf16.msra.mxu1 %v950_v8 }
  0x10   :  { %869 = vmatprep.subr.bf16.mxu1 %v998_v4 }
  0x12   :  { %860 = vmatmul.mubr.msk.bf16.vlgmr.msra.gmra.mxu1 %vm66_vm0, %v948_v6 }
  0x13   :  { %871 = vmatprep.mubr.msk.bf16.mxu1 %vm999_vm1, %v998_v4 }
  0xca   :  { %v104_v9 = vpop.f32.mrf.mxu1 }
  0xcb   :  { %v820_v15 = vpack.c.bf16 %v104_v9, %v104_v9 }
  0xcc   :  { %v106_v10 = vpop.f32.mrf.mxu1 }
  0xcd   :  { %v822_v11 = vpack.c.bf16 %v106_v10, %v106_v10 }
  0xce   :  { %v108_v12 = vpop.f32.mrf.mxu1 }
  0xcf   :  { %471 = vrot.lane.b32.xlu1 %v822_v11, %s1000_s0  ;;  %v184_v13 = vsel %vm179_vm2, %v822_v11, 0  ;;  %v821_v18 = vpack.c.bf16 %v108_v12, %v108_v12 }
  0xd0   :  { %v110_v14 = vpop.f32.mrf.mxu1  ;;  %864 = vmatpush3.bf16.xpose.msra.mxu0 %v184_v13 }
  0xd1   :  { %v823_v16 = vpack.c.bf16 %v110_v14, %v110_v14  ;;  %875 = vmatprep.subr.bf16.mxu0 %v998_v4 }
  0xd2   :  { %v147_v19 = vpop.f32.mrf.mxu1 }
  0xd3   :  { %v230_v17 = vsel %vm179_vm2, %v823_v16, 0  ;;  %469 = vrot.lane.b32.xlu1 %v820_v15, %s1000_s0  ;;  %v824_v20 = vpack.c.bf16 %v147_v19, %v147_v19 }
  0xd4   :  { %870 = vmatpush3.bf16.xpose.msra.mxu1 %v230_v17  ;;  %v861_v21 = vpop.f32.mrf.mxu1 }
  0xd5   :  { %881 = vmatprep.subr.bf16.mxu1 %v998_v4  ;;  %v302_v22 = vsel %vm300_vm3, %v824_v20, 0 }
  0xd6   :  { %v150_v23 = vpop.f32.mrf.mxu1 }
  0xd7   :  { %866 = vmatmul.mubr.msk.bf16.vlgmr.msra.gmra.mxu0 %vm179_vm2, %v820_v15  ;;  %519 = vrot.lane.b32.xlu1 %v821_v18, %s1000_s0  ;;  %v1076_v24 = vpack.c.bf16 %v150_v23, %v150_v23 }
  0xd8   :  { %877 = vmatprep.mubr.msk.bf16.mxu0 %vm999_vm1, %v998_v4  ;;  %876 = vmatpush3.bf16.msra.mxu0 %v302_v22  ;;  %v862_v25 = vpop.f32.mrf.mxu1 }
  0xd9   :  { %887 = vmatprep.subr.bf16.mxu0 %v998_v4  ;;  %v348_v26 = vsel %vm300_vm3, %v1076_v24, 0 }
  0xdb   :  { %872 = vmatmul.mubr.msk.bf16.vlgmr.msra.gmra.mxu1 %vm179_vm2, %v821_v18 }
  0xdc   :  { %883 = vmatprep.mubr.msk.bf16.mxu1 %vm999_vm1, %v998_v4  ;;  %882 = vmatpush3.bf16.msra.mxu1 %v348_v26 }
  0xdd   :  { %899 = vmatprep.subr.bf16.mxu1 %v998_v4 }
 0x141   :  { %v472_v42 = vpop.permute.xlu1 %471 }
 0x142   :  { %v477_v54 = vsel %vm179_vm2, %v472_v42, 0 }
 0x145   :  { %v470_v43 = vpop.permute.xlu1 %469 }
 0x149   :  { %v520_v44 = vpop.permute.xlu1 %519 }
 0x197   :  { %v220_v27 = vpop.f32.mrf.mxu0 }
 0x198   :  { %v273_v28 = vsel %vm272_vm4, %v220_v27, -inf }
 0x199   :  { %v867_v29 = vpop.f32.mrf.mxu0  ;;  %274 = vmax.xlane.f32.xlu1 %v273_v28 }
 0x19b   :  { %v223_v30 = vpop.f32.mrf.mxu0  ;;  %v266_v31 = vpop.f32.mrf.mxu1 }
 0x19c   :  { %v276_v32 = vsel %vm272_vm4, %v266_v31, -inf }
 0x19d   :  { %v868_v33 = vpop.f32.mrf.mxu0  ;;  %277 = vmax.xlane.f32.xlu0 %v276_v32  ;;  %v873_v34 = vpop.f32.mrf.mxu1 }
 0x19f   :  { %v269_v35 = vpop.f32.mrf.mxu1 }
 0x1a1   :  { %v874_v36 = vpop.f32.mrf.mxu1 }
 0x222   :  { %v275_v45 = vpop.xlane.xlu1 %274 }
 0x223   :  { %v279_v46 = vsub.f32 %v220_v27, %v275_v45 }
 0x225   :  { %v281_v47 = vmul.f32 1.442695, %v279_v46 }
 0x226   :  { %v278_v37 = vpop.xlane.xlu0 %277 }
 0x227   :  { %v280_v38 = vsub.f32 %v266_v31, %v278_v37 }
 0x229   :  { %v283_v39 = vmul.f32 1.442695, %v280_v38 }
 0x22b   :  { %959 = vpow2.f32 %v283_v39 }
 0x22c   :  { %961 = vpow2.f32 %v281_v47 }
 0x238   :  { %v960_v40 = vpop.eup %959 }
 0x239   :  { %v288_v41 = vsel %vm272_vm4, %v960_v40, 0.0  ;;  %v962_v48 = vpop.eup %961 }
 0x23a   :  { %289 = vadd.xlane.f32.xlu0 %v288_v41  ;;  %v285_v49 = vsel %vm272_vm4, %v962_v48, 0.0 }
 0x250   :  { %521 = vrot.lane.b32.xlu0 %v823_v16, %s1000_s0 }
 0x26f   :  { %286 = vadd.xlane.f32.xlu0 %v285_v49  ;;  %v957_v49 = vld [vmem:[%s1162_s2 + $0x28] sm:$0xff]  }
 0x285   :  { %593 = vrot.lane.b32.xlu0 %v824_v20, %s1000_s0 }
 0x2c3   :  { %v290_v50 = vpop.xlane.xlu0 %289 }
 0x2c4   :  { %963 = vrcp.f32 %v290_v50  ;;  %v958_v50 = vld [vmem:[%s1162_s2 + $0x20] sm:$0xff]  }
 0x2c7   :  { %v522_v55 = vpop.permute.xlu0 %521 }
 0x2c8   :  { %v527_v56 = vsel %vm179_vm2, %v522_v55, 0 }
 0x2d1   :  { %v964_v51 = vpop.eup %963 }
 0x2d2   :  { %v294_v52 = vmul.f32 %v964_v51, %v960_v40 }
 0x2d4   :  { %v296_v53 = vpack.c.bf16 %v294_v52, %v294_v52 }
 0x2d6   :  { %884 = vmatmul.mubr.msk.bf16.vlgmr.msra.gmra.mxu1 %vm272_vm4, %v296_v53 }
 0x2d7   :  { %900 = vmatpush3.bf16.xpose.msra.mxu1 %v477_v54  ;;  %901 = vmatprep.mubr.msk.bf16.mxu1 %vm999_vm1, %v998_v4 }
 0x2d8   :  { %905 = vmatprep.subr.bf16.mxu1 %v998_v4 }
 0x2de   :  { %902 = vmatmul.mubr.msk.bf16.vlgmr.msra.gmra.mxu1 %vm179_vm2, %v470_v43 }
 0x2df   :  { %906 = vmatpush3.bf16.xpose.msra.mxu1 %v527_v56  ;;  %907 = vmatprep.mubr.msk.bf16.mxu1 %vm999_vm1, %v998_v4 }
 0x2e0   :  { %917 = vmatprep.subr.bf16.mxu1 %v998_v4 }
 0x2e6   :  { %908 = vmatmul.mubr.msk.bf16.vlgmr.msra.gmra.mxu1 %vm179_vm2, %v520_v44  ;;  %v955_v44 = vld [vmem:[%s1162_s2 + $0x38] sm:$0xff]  }
 0x2e7   :  { %919 = vmatprep.mubr.msk.bf16.mxu1 %vm999_vm1, %v998_v4 }
 0x2f8   :  { %v287_v57 = vpop.xlane.xlu0 %286 }
 0x2f9   :  { %965 = vrcp.f32 %v287_v57 }
 0x2fc   :  { %v594_v16 = vpop.permute.xlu0 %593 }
 0x2fd   :  { %v599_v20 = vsel %vm300_vm3, %v594_v16, 0 }
 0x306   :  { %v966_v58 = vpop.eup %965 }
 0x307   :  { %v293_v59 = vmul.f32 %v966_v58, %v962_v48  ;;  %v956_v48 = vld [vmem:[%s1162_s2 + $0x30] sm:$0xff]   ;;  %s1001_s2 = smov [#allocation2]  }
 0x308   :  { %s775_s20 = sshll.u32 %s1001_s2, 4  ;;  %s776_s20 = int_to_ptr.vmem [resolvable:$true] %s775_s20 }
 0x309   :  { %v295_v60 = vpack.c.bf16 %v293_v59, %v293_v59  ;;  %s975_s21 = scalar_lea.vmem %s776_s20, 256  ;;  %p980_p1 = scmp.lt.s32.totalorder %s776_s20, %s776_s20 }
 0x30a   :  { %p976_p0 = scmp.ne.s32.totalorder %s776_s20, %s975_s21  ;;  %p981_p2 = scmp.lt.s32.totalorder %s975_s21, %s975_s21 }
 0x30b   :  { %878 = vmatmul.mubr.msk.bf16.vlgmr.msra.gmra.mxu0 %vm272_vm4, %v295_v60 }
 0x30c   :  { %895 = vmatprep.mubr.msk.bf16.mxu0 %vm999_vm1, %v998_v4  ;;  %888 = vmatpush3.bf16.msra.mxu0 %v951_v61  ;;  %p982_p3 = por %p981_p2, %p980_p1 }
 0x30d   :  { %889 = vmatprep.subr.bf16.mxu0 %v998_v4 }
 0x30e   :  { %p983_p4 = pnand %p982_p3, %p976_p0 }
 0x310   :  { %890 = vmatpush3.bf16.msra.mxu0 %v952_v62 }
 0x311   :  { %891 = vmatprep.subr.bf16.mxu0 %v998_v4 }
 0x314   :  { %892 = vmatpush3.bf16.msra.mxu0 %v953_v63 }
 0x315   :  { %893 = vmatprep.subr.bf16.mxu0 %v998_v4 }
 0x318   :  { %894 = vmatpush3.bf16.msra.mxu0 %v954_v0 }
 0x319   :  { %911 = vmatprep.subr.bf16.mxu0 %v998_v4 }
 0x396   :  { %v384_v1 = vpop.f32.mrf.mxu1 }
 0x398   :  { %v885_v2 = vpop.f32.mrf.mxu1 }
 0x39a   :  { %v387_v3 = vpop.f32.mrf.mxu1 }
 0x39c   :  { %v886_v5 = vpop.f32.mrf.mxu1 }
 0x39e   :  { %v513_v6 = vpop.f32.mrf.mxu1 }
 0x39f   :  { %v569_v7 = vsel %vm272_vm4, %v513_v6, -inf }
 0x3a0   :  { %570 = vmax.xlane.f32.xlu1 %v569_v7  ;;  %v903_v8 = vpop.f32.mrf.mxu1 }
 0x3a2   :  { %v516_v9 = vpop.f32.mrf.mxu1 }
 0x3a4   :  { %v904_v10 = vpop.f32.mrf.mxu1 }
 0x3a6   :  { %v563_v11 = vpop.f32.mrf.mxu1 }
 0x3a7   :  { %v572_v12 = vsel %vm272_vm4, %v563_v11, -inf }
 0x3a8   :  { %573 = vmax.xlane.f32.xlu1 %v572_v12  ;;  %v909_v13 = vpop.f32.mrf.mxu1 }
 0x3aa   :  { %v566_v14 = vpop.f32.mrf.mxu1 }
 0x3ac   :  { %v910_v15 = vpop.f32.mrf.mxu1 }
 0x3cb   :  { %v338_v17 = vpop.f32.mrf.mxu0 }
 0x3cc   :  { %v398_v18 = vpack.c.bf16 %v384_v1, %v338_v17 }
 0x3cd   :  { %v879_v19 = vpop.f32.mrf.mxu0 }
 0x3ce   :  { %896 = vmatmul.mubr.msk.bf16.vlgmr.msra.gmra.mxu0 %vm179_vm2, %v398_v18 }
 0x3cf   :  { %912 = vmatpush3.bf16.msra.mxu0 %v599_v20  ;;  %v341_v21 = vpop.f32.mrf.mxu0  ;;  %913 = vmatprep.mubr.msk.bf16.mxu0 %vm999_vm1, %v998_v4 }
 0x3d0   :  { %923 = vmatprep.subr.bf16.mxu0 %v998_v4 }
 0x3d1   :  { %v880_v22 = vpop.f32.mrf.mxu0 }
 0x429   :  { %v571_v23 = vpop.xlane.xlu1 %570 }
 0x42a   :  { %v575_v25 = vsub.f32 %v513_v6, %v571_v23 }
 0x42c   :  { %v577_v26 = vmul.f32 1.442695, %v575_v25 }
 0x42e   :  { %967 = vpow2.f32 %v577_v26 }
 0x431   :  { %v574_v27 = vpop.xlane.xlu1 %573 }
 0x432   :  { %v576_v28 = vsub.f32 %v563_v11, %v574_v27 }
 0x434   :  { %v579_v29 = vmul.f32 1.442695, %v576_v28 }
 0x436   :  { %969 = vpow2.f32 %v579_v29 }
 0x43b   :  { %v968_v30 = vpop.eup %967 }
 0x43c   :  { %v581_v31 = vsel %vm272_vm4, %v968_v30, 0.0 }
 0x43d   :  { %582 = vadd.xlane.f32.xlu1 %v581_v31 }
 0x443   :  { %v970_v32 = vpop.eup %969 }
 0x444   :  { %v584_v33 = vsel %vm272_vm4, %v970_v32, 0.0 }
 0x445   :  { %585 = vadd.xlane.f32.xlu1 %v584_v33 }
 0x456   :  { %641 = vrot.lane.b32.xlu1 %v1076_v24, %s1000_s0 }
 0x48e   :  { %v460_v34 = vpop.f32.mrf.mxu0 }
 0x490   :  { %v897_v35 = vpop.f32.mrf.mxu0 }
 0x492   :  { %v463_v36 = vpop.f32.mrf.mxu0 }
 0x494   :  { %v898_v37 = vpop.f32.mrf.mxu0 }
 0x4c6   :  { %v583_v38 = vpop.xlane.xlu1 %582 }
 0x4c7   :  { %971 = vrcp.f32 %v583_v38 }
 0x4ce   :  { %v586_v39 = vpop.xlane.xlu1 %585 }
 0x4cf   :  { %973 = vrcp.f32 %v586_v39 }
 0x4d2   :  { %v642_v40 = vpop.permute.xlu1 %641 }
 0x4d3   :  { %v647_v41 = vsel %vm300_vm3, %v642_v40, 0 }
 0x4d4   :  { %v972_v42 = vpop.eup %971  ;;  %918 = vmatpush3.bf16.msra.mxu1 %v647_v41 }
 0x4d5   :  { %v589_v43 = vmul.f32 %v972_v42, %v968_v30 }
 0x4d7   :  { %v591_v45 = vpack.c.bf16 %v589_v43, %v589_v43 }
 0x4d9   :  { %914 = vmatmul.mubr.msk.bf16.vlgmr.msra.gmra.mxu0 %vm272_vm4, %v591_v45 }
 0x4da   :  { %924 = vmatpush3.bf16.msra.mxu0 %v955_v44  ;;  %931 = vmatprep.mubr.msk.bf16.mxu0 %vm999_vm1, %v998_v4 }
 0x4db   :  { %925 = vmatprep.subr.bf16.mxu0 %v998_v4 }
 0x4dc   :  { %v974_v24 = vpop.eup %973 }
 0x4dd   :  { %v590_v46 = vmul.f32 %v974_v24, %v970_v32 }
 0x4de   :  { %926 = vmatpush3.bf16.msra.mxu0 %v956_v48 }
 0x4df   :  { %v592_v47 = vpack.c.bf16 %v590_v46, %v590_v46  ;;  %927 = vmatprep.subr.bf16.mxu0 %v998_v4 }
 0x4e1   :  { %920 = vmatmul.mubr.msk.bf16.vlgmr.msra.gmra.mxu1 %vm272_vm4, %v592_v47 }
 0x4e2   :  { %928 = vmatpush3.bf16.msra.mxu0 %v957_v49 }
 0x4e3   :  { %929 = vmatprep.subr.bf16.mxu0 %v998_v4  ;;  %v795_v4 = vld [vmem:[%s1163_s3] ss:$0 sm:$0xff] }
 0x4e4   :  { %v467_v60 = vadd.f32 %v795_v4, %v460_v34  ;;  %v468_v0 = vadd.f32 %v795_v4, %v463_v36 }
 0x4e6   :  { %930 = vmatpush3.bf16.msra.mxu0 %v958_v50 }
 0x599   :  { %v635_v51 = vpop.f32.mrf.mxu0 }
 0x59b   :  { %v915_v52 = vpop.f32.mrf.mxu0 }
 0x59d   :  { %v638_v53 = vpop.f32.mrf.mxu0 }
 0x59f   :  { %v916_v54 = vpop.f32.mrf.mxu0 }
 0x5a1   :  { %v683_v55 = vpop.f32.mrf.mxu1 }
 0x5a2   :  { %v697_v56 = vpack.c.bf16 %v683_v55, %v635_v51 }
 0x5a3   :  { %v921_v57 = vpop.f32.mrf.mxu1 }
 0x5a4   :  { %932 = vmatmul.mubr.msk.bf16.vlgmr.msra.gmra.mxu0 %vm179_vm2, %v697_v56 }
 0x5a5   :  { %v686_v58 = vpop.f32.mrf.mxu1 }
 0x5a7   :  { %v922_v59 = vpop.f32.mrf.mxu1 }
 0x664   :  { %v759_v61 = vpop.f32.mrf.mxu0 }
 0x665   :  { %v766_v62 = vadd.f32 %v759_v61, %v467_v60 }
 0x666   :  { %v933_v63 = vpop.f32.mrf.mxu0 }
 0x667   :  { %768 = vst.msk [vmem:[#allocation2] sm:$0xff] %vm66_vm0, %v766_v62 }
 0x668   :  { %v762_v1 = vpop.f32.mrf.mxu0 }
 0x669   :  { %v767_v2 = vadd.f32 %v762_v1, %v468_v0 }
 0x66a   :  { %v934_v3 = vpop.f32.mrf.mxu0 }
 0x66b   :  { %769 = vst.msk [vmem:[#allocation2 + $0x8] sm:$0xff] %vm66_vm0, %v767_v2 }
 0x66c   :  { %986 = shalt.err (!%p983_p4)
}
 0x66d   :  { %s1002_s3 = smov 128   ;;  %s1003_s22 = smov 8  }
 0x66e   :  { %781 = dma.vmem_to_hbm [thread:$0]  %s776_s20, 256, %s1164_s4, [#allocation3], %s1002_s3, %s1002_s3, %s1003_s22  }
 0x66f   :  { %995 = dma.done.wait [#allocation3], 256  }
 0x670   :  { %996 = vsyncadd [#allocation3], 4294967040 }
 0x671   :  { %785 = vsyncpa [#allocation3], 1 }

</bundles_post_ra>
